<compile_context>
chip_gen: v5e
topology: v5e:2x2
jax: 0.10.0
libtpu: 0.0.40
codegen_flags: <defaults>
</compile_context>

<pallas_src>
import numpy as np
import jax
import jax.numpy as jnp
from jax.experimental import pallas as pl
from jax.experimental.pallas import tpu as pltpu


def _round_up(n, m):
    return ((n + m - 1) // m) * m


# --------------------------------------------------------------------------- #
# Kernel: one invocation per batch tile, two MXU passes, no scratch.
# --------------------------------------------------------------------------- #
def _long_mlp_kernel(x_ref, wbig_ref, bcat_ref, wout_ref, out_ref):
    # Pass 1: all feature groups at once via the block-diagonal packed weight.
    pre = jnp.dot(x_ref[...], wbig_ref[...],
                  preferred_element_type=jnp.float32) + bcat_ref[...]
    hidden = jax.nn.sigmoid(pre)  # f32 elementwise (v5e has no bf16 VPU/EUP)

    # TODO(synk): training-mode dropout (mask + 1/(1-p)) not implemented; this
    # matches the PyTorch module in eval mode (F.dropout identity).

    # Pass 2: output Linear. The output bias is folded into wout via the spare
    # packed hidden column that is exactly sigmoid(0) = 0.5.
    out_ref[...] = jnp.dot(hidden.astype(wout_ref.dtype), wout_ref[...],
                           preferred_element_type=jnp.float32)


# --------------------------------------------------------------------------- #
# One-time parameter packing (hoisted out of the per-call path).
# --------------------------------------------------------------------------- #
def prepack_params(params, features_group, num_features, *,
                   compute_dtype=jnp.float32, lane=128):
    """Pack per-group Linear weights into block-diagonal MXU-friendly slabs.

    params: dict with
        'group_w': list of (H, group_size)  (torch Linear weight layout)
        'group_b': list of (H,)
        'out_w':   (O, G*H)                 (torch Linear weight layout)
        'out_b':   (O,)
    """
    G = len(features_group)
    H = int(params['group_w'][0].shape[0])
    O = int(params['out_w'].shape[0])
    GH = G * H
    # +1 spare hidden column carries the folded output bias; round to 128 lanes.
    GHp = _round_up(GH + 1, lane)
    Op = _round_up(O, lane)

    # Block-diagonal group weight, rows indexed by original feature id.
    W_big = np.zeros((num_features, GHp), np.float32)
    b_cat = np.zeros((1, GHp), np.float32)
    for g, group in enumerate(features_group):
        wg = np.asarray(params['group_w'][g], np.float32)          # (H, gs)
        for j, f in enumerate(group):
            W_big[int(f), g * H:(g + 1) * H] += wg[:, j]
        b_cat[0, g * H:(g + 1) * H] = np.asarray(params['group_b'][g], np.float32)

    # Output weight, padded to lane width; bias folded into row GH
    # (hidden[:, GH] == sigmoid(0) == 0.5 exactly, and 0.5 * (2*b) == b).
    W_out = np.zeros((GHp, Op), np.float32)
    W_out[:GH, :O] = np.asarray(params['out_w'], np.float32).T     # (GH, O)
    W_out[GH, :O] = 2.0 * np.asarray(params['out_b'], np.float32)

    return {
        'W_big': jnp.asarray(W_big, dtype=compute_dtype),
        'b_cat': jnp.asarray(b_cat, dtype=jnp.float32),   # added post f32-accumulate
        'W_out': jnp.asarray(W_out, dtype=compute_dtype),
        'num_features': num_features,
        'output_size': O,
        'compute_dtype': compute_dtype,
    }


# --------------------------------------------------------------------------- #
# Forward pass.
# --------------------------------------------------------------------------- #
def longitudinal_mlp_forward(x, packed):
    """x: (B, num_features) float32 -> (B, output_size) float32."""
    W_big, b_cat, W_out = packed['W_big'], packed['b_cat'], packed['W_out']
    O = packed['output_size']
    dtype = packed['compute_dtype']

    B, F = x.shape
    GHp = W_big.shape[1]
    Op = W_out.shape[1]

    # Batch tiling: whole batch in one block when small; 256-row tiles when
    # large (multiple of 8 always; "parallel" axis -> megacore on v7x).
    # NOTE: when scaling B/H/O, re-derive TB against v7x's 64 MiB VMEM.
    TB = 256 if B > 512 else _round_up(B, 8)
    Bp = _round_up(B, TB)

    xp = x.astype(dtype)
    if Bp != B:
        xp = jnp.pad(xp, ((0, Bp - B), (0, 0)))

    out = pl.pallas_call(
        _long_mlp_kernel,
        out_shape=jax.ShapeDtypeStruct((Bp, Op), jnp.float32),
        grid_spec=pltpu.PrefetchScalarGridSpec(
            num_scalar_prefetch=0,
            grid=(Bp // TB,),
            in_specs=[
                pl.BlockSpec((TB, F),   lambda i: (i, 0)),   # batch-tiled input
                pl.BlockSpec((F, GHp),  lambda i: (0, 0)),   # packed group weights
                pl.BlockSpec((1, GHp),  lambda i: (0, 0)),   # packed group biases
                pl.BlockSpec((GHp, Op), lambda i: (0, 0)),   # output weights (+bias row)
            ],
            out_specs=pl.BlockSpec((TB, Op), lambda i: (i, 0)),
        ),
        compiler_params=pltpu.CompilerParams(
            dimension_semantics=("parallel",),
        ),
    )(xp, W_big, b_cat, W_out)

    return out[:B, :O]


# --------------------------------------------------------------------------- #
# Pure-JAX reference (mirrors the PyTorch forward, eval-mode dropout).
# --------------------------------------------------------------------------- #
def _reference_forward(x, params, features_group):
    outs = []
    for idx, group in enumerate(features_group):
        gx = x[:, jnp.asarray(group, dtype=jnp.int32)]
        h = jax.nn.sigmoid(gx @ params['group_w'][idx].T + params['group_b'][idx])
        outs.append(h)
    concat = jnp.concatenate(outs, axis=1)
    return concat @ params['out_w'].T + params['out_b']


def _init_params(key, hidden_size, output_size, features_group):
    """Deterministic init mimicking torch.nn.Linear (uniform +/- 1/sqrt(fan_in))."""
    params = {'group_w': [], 'group_b': []}
    for group in features_group:
        gs = len(group)
        key, kw, kb = jax.random.split(key, 3)
        bound = 1.0 / np.sqrt(gs)
        params['group_w'].append(
            jax.random.uniform(kw, (hidden_size, gs), jnp.float32, -bound, bound))
        params['group_b'].append(
            jax.random.uniform(kb, (hidden_size,), jnp.float32, -bound, bound))
    fan_in = hidden_size * len(features_group)
    key, kw, kb = jax.random.split(key, 3)
    bound = 1.0 / np.sqrt(fan_in)
    params['out_w'] = jax.random.uniform(
        kw, (output_size, fan_in), jnp.float32, -bound, bound)
    params['out_b'] = jax.random.uniform(
        kb, (output_size,), jnp.float32, -bound, bound)
    return params


if __name__ == "__main__":
    # Small, module-consistent shapes.
    batch = 8
    hidden_size = 32
    output_size = 4
    dropout_rate = 0.1  # identity at inference
    features_group = [[0, 1, 2, 3], [4, 5, 6, 7, 8], [9, 10, 11]]  # F = 12
    num_features = 12

    key = jax.random.PRNGKey(0)
    key, kx = jax.random.split(key)
    x = jax.random.normal(kx, (batch, num_features), jnp.float32)
    params = _init_params(key, hidden_size, output_size, features_group)

    ref = _reference_forward(x, params, features_group)

    # f32 path: exact module semantics.
    packed_f32 = prepack_params(params, features_group, num_features,
                                compute_dtype=jnp.float32)
    out = jax.block_until_ready(longitudinal_mlp_forward(x, packed_f32))
    np.testing.assert_allclose(np.asarray(out), np.asarray(ref),
                               rtol=1e-5, atol=1e-5)

    # bf16 MXU path (f32 accumulate / f32 sigmoid): perf option, looser tol.
    packed_bf16 = prepack_params(params, features_group, num_features,
                                 compute_dtype=jnp.bfloat16)
    out_bf16 = jax.block_until_ready(longitudinal_mlp_forward(x, packed_bf16))
    np.testing.assert_allclose(np.asarray(out_bf16), np.asarray(ref),
                               rtol=5e-2, atol=5e-2)

    print("KERNEL_OK")
</pallas_src>

<mosaic_0001>
module attributes {stable_mosaic.version = 11 : i64} {
  func.func @_long_mlp_kernel(%arg0: i32, %arg1: memref<8x12xf32, #tpu.memory_space<vmem>>, %arg2: memref<12x128xf32, #tpu.memory_space<vmem>>, %arg3: memref<1x128xf32, #tpu.memory_space<vmem>>, %arg4: memref<128x128xf32, #tpu.memory_space<vmem>>, %arg5: memref<8x128xf32, #tpu.memory_space<vmem>>) attributes {dimension_semantics = [#tpu.dimension_semantics<parallel>], iteration_bounds = array<i64: 1>, scalar_prefetch = 0 : i64, scratch_operands = 0 : i64, tpu.core_type = #tpu.core_type<tc>, window_params = [{transform_indices = @transform_0, window_bounds = array<i64: 8, 12>}, {pipeline_mode = #tpu.pipeline_mode<synchronous>, transform_indices = @transform_1, window_bounds = array<i64: 12, 128>}, {pipeline_mode = #tpu.pipeline_mode<synchronous>, transform_indices = @transform_2, window_bounds = array<i64: 1, 128>}, {pipeline_mode = #tpu.pipeline_mode<synchronous>, transform_indices = @transform_3, window_bounds = array<i64: 128, 128>}, {transform_indices = @transform_4, window_bounds = array<i64: 8, 128>}]} {
    %c0 = arith.constant 0 : index
    %c0_0 = arith.constant 0 : index
    %0 = vector.load %arg1[%c0, %c0_0] : memref<8x12xf32, #tpu.memory_space<vmem>>, vector<8x12xf32>
    %c0_1 = arith.constant 0 : index
    %c0_2 = arith.constant 0 : index
    %1 = vector.load %arg2[%c0_1, %c0_2] : memref<12x128xf32, #tpu.memory_space<vmem>>, vector<12x128xf32>
    %cst = arith.constant dense<0.000000e+00> : vector<8x128xf32>
    %2 = tpu.matmul %0, %1, %cst {dimension_numbers = #tpu.dot_dimension_numbers<[1], [0], [0], [1], [0, 0, 1, 1], [], []>} : vector<8x12xf32>, vector<12x128xf32>, vector<8x128xf32> -> vector<8x128xf32>
    %c0_3 = arith.constant 0 : index
    %c0_4 = arith.constant 0 : index
    %3 = vector.load %arg3[%c0_3, %c0_4] : memref<1x128xf32, #tpu.memory_space<vmem>>, vector<1x128xf32>
    %4 = vector.broadcast %3 : vector<1x128xf32> to vector<8x128xf32>
    %5 = arith.addf %2, %4 : vector<8x128xf32>
    %6 = arith.negf %5 : vector<8x128xf32>
    %7 = math.exp %6 : vector<8x128xf32>
    %cst_5 = arith.constant 1.000000e+00 : f32
    %8 = vector.broadcast %cst_5 : f32 to vector<8x128xf32>
    %9 = arith.addf %8, %7 : vector<8x128xf32>
    %10 = arith.divf %8, %9 : vector<8x128xf32>
    %c0_6 = arith.constant 0 : index
    %c0_7 = arith.constant 0 : index
    %11 = vector.load %arg4[%c0_6, %c0_7] : memref<128x128xf32, #tpu.memory_space<vmem>>, vector<128x128xf32>
    %cst_8 = arith.constant dense<0.000000e+00> : vector<8x128xf32>
    %12 = tpu.matmul %10, %11, %cst_8 {dimension_numbers = #tpu.dot_dimension_numbers<[1], [0], [0], [1], [0, 0, 1, 1], [], []>} : vector<8x128xf32>, vector<128x128xf32>, vector<8x128xf32> -> vector<8x128xf32>
    %c0_9 = arith.constant 0 : index
    %c0_10 = arith.constant 0 : index
    %13 = vector.load %arg5[%c0_9, %c0_10] : memref<8x128xf32, #tpu.memory_space<vmem>>, vector<8x128xf32>
    tpu.vector_store %arg5[%c0_9, %c0_10], %12 {strides = array<i32>} : memref<8x128xf32, #tpu.memory_space<vmem>>, vector<8x128xf32>,
    return
  }
  func.func @transform_0(%arg0: i32) -> (i32, i32) {
    %c0_i32 = arith.constant 0 : i32
    %c0_i32_0 = arith.constant 0 : i32
    return %arg0, %c0_i32 : i32, i32
  }
  func.func @transform_1(%arg0: i32) -> (i32, i32) {
    %c0_i32 = arith.constant 0 : i32
    %c0_i32_0 = arith.constant 0 : i32
    %c0_i32_1 = arith.constant 0 : i32
    return %c0_i32, %c0_i32_0 : i32, i32
  }
  func.func @transform_2(%arg0: i32) -> (i32, i32) {
    %c0_i32 = arith.constant 0 : i32
    %c0_i32_0 = arith.constant 0 : i32
    %c0_i32_1 = arith.constant 0 : i32
    return %c0_i32, %c0_i32_0 : i32, i32
  }
  func.func @transform_3(%arg0: i32) -> (i32, i32) {
    %c0_i32 = arith.constant 0 : i32
    %c0_i32_0 = arith.constant 0 : i32
    %c0_i32_1 = arith.constant 0 : i32
    return %c0_i32, %c0_i32_0 : i32, i32
  }
  func.func @transform_4(%arg0: i32) -> (i32, i32) {
    %c0_i32 = arith.constant 0 : i32
    %c0_i32_0 = arith.constant 0 : i32
    return %arg0, %c0_i32 : i32, i32
  }
}

</mosaic_0001>

<bundles_post_ra>
// kernel: tpu_custom_call.1
= control target key start
LH: loop header
LB: loop body
LE: loop exit
PB: predicated region body
PF: predicated region fallthrough
CT: control target
= control target key end

     0   :  { %9 = vsyncpa [#allocation3], 0  ;;  %s334_s0 = inlined_call_operand.hbm [shape: f32[8,12], index: 0, kind: input, shape index: {}]   ;;  %s335_s1 = inlined_call_operand.hbm [shape: f32[12,128], index: 1, kind: input, shape index: {}]   ;;  %s336_s2 = inlined_call_operand.vmem [shape: f32[1,128], index: 2, kind: input, shape index: {}]   ;;  %s337_s3 = inlined_call_operand.hbm [shape: f32[128,128], index: 3, kind: input, shape index: {}]   ;;  %s338_s4 = inlined_call_operand.hbm [shape: f32[8,128], index: 4, kind: output, shape index: {}]  }
   0x1   :  { %10 = vsyncpa [#allocation6], 0  ;;  %s27_s17 = sshll.u32 %s335_s1, 4  ;;  %s28_s17 = int_to_ptr.hbm [resolvable:$true] %s27_s17 }
   0x2   :  { %11 = vsyncpa [#allocation4], 0  ;;  %s288_s18 = smov [#allocation5]   ;;  %s17_s22 = sshll.u32 %s334_s0, 4  ;;  %s18_s22 = int_to_ptr.hbm [resolvable:$true] %s17_s22 }
   0x3   :  { %s29_s19 = sshll.u32 %s288_s18, 4  ;;  %s289_s23 = smov 128   ;;  %s30_s19 = int_to_ptr.vmem [resolvable:$true] %s29_s19 }
   0x4   :  { %s290_s24 = smov 8   ;;  %s291_s25 = smov [#allocation2]  }
   0x5   :  { %35 = dma.hbm_to_vmem [thread:$0]  %s28_s17, 256, %s30_s19, [#allocation6], %s289_s23, %s289_s23, %s290_s24  }
   0x6   :  { %s19_s26 = sshll.u32 %s291_s25, 4  ;;  %s42_s29 = sshll.u32 %s337_s3, 4  ;;  %s20_s26 = int_to_ptr.vmem [resolvable:$true] %s19_s26  ;;  %s43_s29 = int_to_ptr.hbm [resolvable:$true] %s42_s29 }
   0x7   :  { %22 = dma.hbm_to_vmem [thread:$0]  %s18_s22, 128, %s20_s26, [#allocation3]  }
   0x8   :  { %s292_s1 = smov [#allocation7]  }
   0x9   :  { %s44_s30 = sshll.u32 %s292_s1, 4  ;;  %s45_s30 = int_to_ptr.vmem [resolvable:$true] %s44_s30 }
   0xa   :  { %50 = dma.hbm_to_vmem [thread:$0]  %s43_s29, 2048, %s45_s30, [#allocation6], %s289_s23, %s289_s23, %s290_s24  }
   0xb   :  { %282 = dma.done.wait [#allocation3], 128  }
   0xc   :  { %283 = vsyncadd [#allocation3], 4294967168 }
   0xd   :  { %284 = dma.done.wait [#allocation6], 2304  }
   0xe   :  { %285 = vsyncadd [#allocation6], 4294964992  ;;  %vm74_vm0 = vcmask 1043456   ;;  %v65_v0 = vld [vmem:[#allocation5 + $0x8] sm:$0xf]  ;;  %v64_v1 = vld [vmem:[#allocation5] sm:$0xff] }
   0xf   :  { %172 = vmatpush.msk.msra.mxu0 %vm74_vm0, %v65_v0  ;;  %v63_v2 = vld [vmem:[#allocation2] sm:$0xff]  ;;  %vm70_vm1 = vcmask 97280   ;;  %v132_v3 = vld [vmem:[#allocation7 + $0x78] sm:$0xff]  ;;  %v131_v4 = vld [vmem:[#allocation7 + $0x70] sm:$0xff]  ;;  %s161_s8 = sshll.u32 %s338_s4, 4  ;;  %s162_s8 = int_to_ptr.hbm [resolvable:$true] %s161_s8 }
  0x10   :  { %133 = vmatpush.msra.mxu1 %v132_v3  ;;  %v130_v5 = vld [vmem:[#allocation7 + $0x68] sm:$0xff]  ;;  %v129_v6 = vld [vmem:[#allocation7 + $0x60] sm:$0xff]  ;;  %v128_v7 = vld [vmem:[#allocation7 + $0x58] sm:$0xff] }
  0x11   :  { %93 = vmatpush.msra.mxu0 %v64_v1  ;;  %v127_v8 = vld [vmem:[#allocation7 + $0x50] sm:$0xff]  ;;  %v126_v9 = vld [vmem:[#allocation7 + $0x48] sm:$0xff]  ;;  %v125_v10 = vld [vmem:[#allocation7 + $0x40] sm:$0xff] }
  0x12   :  { %173 = vmatmul.msk.f32.vlgmr.msra.gmra.mxu0 %vm70_vm1, %v63_v2  ;;  %134 = vmatpush.msra.mxu1 %v131_v4  ;;  %v124_v11 = vld [vmem:[#allocation7 + $0x38] sm:$0xff]  ;;  %v123_v12 = vld [vmem:[#allocation7 + $0x30] sm:$0xff]  ;;  %v122_v13 = vld [vmem:[#allocation7 + $0x28] sm:$0xff] }
  0x13   :  { %v121_v14 = vld [vmem:[#allocation7 + $0x20] sm:$0xff]  ;;  %v120_v15 = vld [vmem:[#allocation7 + $0x18] sm:$0xff]  ;;  %v119_v16 = vld [vmem:[#allocation7 + $0x10] sm:$0xff] }
  0x14   :  { %135 = vmatpush.msra.mxu1 %v130_v5  ;;  %v118_v17 = vld [vmem:[#allocation7 + $0x8] sm:$0xff]  ;;  %v117_v18 = vld [vmem:[#allocation7] sm:$0xff] }
  0x15   :  { %v181_v19 = vld [vmem:[%s336_s2] ss:$0 sm:$0xff]  ;;  %s293_s2 = smov [#allocation8]  }
  0x16   :  { %136 = vmatpush.msra.mxu1 %v129_v6  ;;  %s159_s5 = sshll.u32 %s293_s2, 4  ;;  %s160_s5 = int_to_ptr.vmem [resolvable:$true] %s159_s5 }
  0x18   :  { %137 = vmatpush.msra.mxu1 %v128_v7 }
  0x1a   :  { %138 = vmatpush.msra.mxu1 %v127_v8 }
  0x1c   :  { %139 = vmatpush.msra.mxu1 %v126_v9 }
  0x1e   :  { %140 = vmatpush.msra.mxu1 %v125_v10 }
  0x20   :  { %141 = vmatpush.msra.mxu1 %v124_v11 }
  0x22   :  { %142 = vmatpush.msra.mxu1 %v123_v12 }
  0x24   :  { %143 = vmatpush.msra.mxu1 %v122_v13 }
  0x26   :  { %144 = vmatpush.msra.mxu1 %v121_v14 }
  0x28   :  { %145 = vmatpush.msra.mxu1 %v120_v15 }
  0x2a   :  { %146 = vmatpush.msra.mxu1 %v119_v16 }
  0x2c   :  { %147 = vmatpush.msra.mxu1 %v118_v17 }
  0x2e   :  { %148 = vmatpush.msra.mxu1 %v117_v18 }
  0x8f   :  { %v95_v20 = vpop.f32.mrf.mxu0 }
  0x90   :  { %v96_v21 = vadd.f32 %v181_v19, %v95_v20 }
  0x92   :  { %v174_v22 = vmul.f32 -1.442695, %v96_v21 }
  0x94   :  { %182 = vpow2.f32 %v174_v22 }
  0x9a   :  { %v183_v23 = vpop.eup %182 }
  0x9b   :  { %v101_v24 = vadd.f32 1.0, %v183_v23 }
  0x9d   :  { %184 = vrcp.f32 %v101_v24  ;;  %v113_v28 = vand.u32 2147483648, %v101_v24  ;;  %v111_v30 = vand.u32 2147483647, %v101_v24  ;;  %vm107_vm3 = vweird.f32 %v101_v24 }
  0x9f   :  { %v114_v32 = vor.u32 1.1754944e-38, %v113_v28  ;;  %vm112_vm5 = vcmp.eq.f32.partialorder %v111_v30, 8.507059e+37 }
  0xa3   :  { %v185_v25 = vpop.eup %184 }
  0xa4   :  { %v103_v26 = vmul.f32 %v185_v25, %v101_v24  ;;  %vm108_vm2 = vweird.f32 %v185_v25 }
  0xa5   :  { %vm109_vm4 = vmor %vm107_vm3, %vm108_vm2 }
  0xa6   :  { %v104_v27 = vsub.f32 1.0, %v103_v26 }
  0xa8   :  { %v105_v29 = vmul.f32 %v185_v25, %v104_v27 }
  0xaa   :  { %v106_v31 = vadd.f32 %v185_v25, %v105_v29 }
  0xac   :  { %v110_v33 = vsel %vm109_vm4, %v185_v25, %v106_v31 }
  0xad   :  { %v115_v34 = vsel %vm112_vm5, %v114_v32, %v110_v33 }
  0xae   :  { %149 = vmatmul.f32.vlgmr.msra.gmra.mxu1 %v115_v34 }
 0x12b   :  { %v150_v35 = vpop.f32.mrf.mxu1 }
 0x12c   :  { %153 = vst [vmem:[#allocation8] sm:$0xff] %v150_v35 }
 0x12d   :  { %164 = dma.vmem_to_hbm [thread:$0]  %s160_s5, 128, %s162_s8, [#allocation4]  }
 0x12e   :  { %286 = dma.done.wait [#allocation4], 128  }
 0x12f   :  { %287 = vsyncadd [#allocation4], 4294967168 }
 0x130   :  { %169 = vsyncpa [#allocation3], 1 }
 0x131   :  { %170 = vsyncpa [#allocation6], 1 }
 0x132   :  { %171 = vsyncpa [#allocation4], 1 }

</bundles_post_ra>
